<compile_context>
chip_gen: v6e
topology: v6e:2x2x1
jax: 0.10.0
libtpu: 0.0.40
codegen_flags: <defaults>
</compile_context>

<pallas_src>
import functools

import jax
import jax.numpy as jnp
from jax import lax
from jax.experimental import pallas as pl
from jax.experimental.pallas import tpu as pltpu


# ----------------------------------------------------------------------------
# Fused kernel (channels-major):
#   [im2col conv matmul] -> +BN shift (scale pre-folded) -> SiLU
#   -> [detect 1x1 matmul, f32] -> +bias -> sigmoid -> lane-dense store
# ----------------------------------------------------------------------------
def fused_backbone_detect_kernel(p_ref, w1_ref, shift_ref, w2_ref, b2_ref,
                                 o_ref):
    # p_ref:     (1, 9*Cin, tile_h*W)  im2col patches, channels on sublanes,
    #                                  pixels on the 128-lane axis
    # w1_ref:    (Cmid, 9*Cin)         conv weight^T with BN scale folded in
    # shift_ref: (Cmid, 1)             folded BN shift (f32)
    # w2_ref:    (Cdet, Cmid)          detect 1x1 conv weight^T (f32)
    # b2_ref:    (Cdet, 1)             detect bias (f32)
    # o_ref:     (1, Cdet, tile_h*W)   unpadded, lane-dense output tile
    # Single MXU matmul for the 3x3 conv (K = 9*Cin), f32 accumulation.
    y = jnp.dot(w1_ref[...], p_ref[0], preferred_element_type=jnp.float32)

    # Folded eval-mode BatchNorm shift + SiLU.  Channels are on sublanes, so
    # the whole epilogue runs on lane-dense vregs (no padded-lane EUP work).
    y = y + shift_ref[...]
    y = y * jax.nn.sigmoid(y)

    # Detect head fused in-kernel (feature map never leaves VMEM).  Kept in
    # f32: it is tiny and this matches the f32 PyTorch reference bit-closer.
    det = jnp.dot(w2_ref[...], y, preferred_element_type=jnp.float32)
    det = jax.nn.sigmoid(det + b2_ref[...])

    # Unpadded store: last dim tile_h*W is a multiple of 128 -> unmasked vst,
    # and each of the Cdet output DMA rows is one contiguous HBM chunk.
    o_ref[...] = det[None].astype(o_ref.dtype)


# ----------------------------------------------------------------------------
# Generation-aware VMEM limit and tile_h selection
# ----------------------------------------------------------------------------
def _vmem_limit_bytes():
    # v5e/v6e: 128 MiB physical -> ~112 MiB limit; v7x: 64 MiB -> ~48 MiB.
    try:
        cap = int(pltpu.get_tpu_info().vmem_capacity_bytes)
    except Exception:  # not on TPU / API unavailable: be conservative (v7x)
        cap = 64 << 20
    return max(32 << 20, min(cap - (16 << 20), 112 << 20))


def _pick_tile_h(H, W, Kp, cmid, cdet, in_bytes, out_bytes, vmem_limit_bytes):
    rup = lambda x, m: ((x + m - 1) // m) * m
    # VMEM bytes per unit of tile_h: double-buffered patch tile, double-
    # buffered output tile, plus f32 intermediates (y, det) live in-kernel.
    per_row = W * (2 * rup(Kp, 8) * in_bytes
                   + 2 * rup(cdet, 8) * out_bytes
                   + (rup(cmid, 8) + rup(cdet, 8)) * 4)
    budget = max(vmem_limit_bytes // 2, 1 << 20)   # headroom for compiler scratch
    cap = max(1, budget // per_row)
    cands = [t for t in range(1, H + 1)
             if H % t == 0 and t <= cap and ((t * W) % 128 == 0 or t == H)]
    if not cands:
        cands = [t for t in range(1, H + 1) if H % t == 0 and t <= cap] or [1]

    def score(t):
        steps = H // t
        return (steps >= 2,        # keep >=2 grid steps (pipelining / v7x 2 TCs)
                steps % 2 == 0,    # even split across the two v7x TensorCores
                t)                 # then the biggest tile: fewest steps, big DMAs

    return max(cands, key=score)


# ----------------------------------------------------------------------------
# Wrapper: params prep + pallas_call
# ----------------------------------------------------------------------------
def fused_backbone_detect(x_nchw, params, *, eps=1e-3, tile_h=None,
                          use_bf16=True, out_dtype=jnp.float32):
    N, Cin, H, W = x_nchw.shape
    conv_w = params["conv_w"]                  # (3, 3, Cin, Cmid)
    Cmid = conv_w.shape[-1]
    det_w = params["det_w"]                    # (Cdet, Cmid)
    det_b = params["det_b"]                    # (Cdet,)
    Cdet = det_w.shape[0]
    Kp = 9 * Cin

    # Fold eval-mode BatchNorm into the conv weight (scale) + per-channel shift.
    # NOTE: eps must match the checkpoint (YOLOv5/v7 use 1e-3; nn.BatchNorm2d
    # default is 1e-5).
    scale = params["bn_gamma"] * lax.rsqrt(params["bn_var"] + eps)     # (Cmid,)
    w1 = jnp.transpose(conv_w, (3, 0, 1, 2)).reshape(Cmid, Kp)
    w1s = (w1 * scale[:, None]).astype(jnp.float32)
    shift = (params["bn_beta"] - params["bn_mean"] * scale
             ).reshape(Cmid, 1).astype(jnp.float32)

    w2 = det_w.astype(jnp.float32)             # detect matmul stays f32
    b2 = det_b.reshape(Cdet, 1).astype(jnp.float32)

    # Channels-major im2col: (N, 9*Cin, H*W); K order (kh, kw, cin) matches w1.
    # TODO(synk): move this 3x3 tap expansion in-kernel (halo block) for real
    #             backbone layers with large Cin — it is a 9x-expanded extra
    #             HBM pass, worst on v5e.
    xpad = jnp.pad(x_nchw, ((0, 0), (0, 0), (1, 1), (1, 1)))
    patches = jnp.concatenate(
        [xpad[:, :, kh:kh + H, kw:kw + W] for kh in range(3) for kw in range(3)],
        axis=1).reshape(N, Kp, H * W)

    in_dtype = jnp.bfloat16 if use_bf16 else jnp.float32
    patches = patches.astype(in_dtype)         # halves input DMA bytes
    w1s = w1s.astype(in_dtype)

    vmem_limit = _vmem_limit_bytes()
    if tile_h is None:
        tile_h = _pick_tile_h(H, W, Kp, Cmid, Cdet,
                              jnp.dtype(in_dtype).itemsize,
                              jnp.dtype(out_dtype).itemsize,
                              vmem_limit)
    assert H % tile_h == 0 and ((tile_h * W) % 128 == 0 or tile_h == H), \
        (H, W, tile_h)
    tM = tile_h * W
    grid = (N, H // tile_h)

    return pl.pallas_call(
        fused_backbone_detect_kernel,
        out_shape=jax.ShapeDtypeStruct((N, Cdet, H * W), out_dtype),
        grid_spec=pltpu.PrefetchScalarGridSpec(
            num_scalar_prefetch=0,
            grid=grid,
            in_specs=[
                pl.BlockSpec((1, Kp, tM), lambda n, h: (n, 0, h)),
                pl.BlockSpec((Cmid, Kp), lambda n, h: (0, 0)),
                pl.BlockSpec((Cmid, 1), lambda n, h: (0, 0)),
                pl.BlockSpec((Cdet, Cmid), lambda n, h: (0, 0)),
                pl.BlockSpec((Cdet, 1), lambda n, h: (0, 0)),
            ],
            out_specs=pl.BlockSpec((1, Cdet, tM), lambda n, h: (n, 0, h)),
        ),
        compiler_params=pltpu.CompilerParams(
            # batch and spatial tiles both parallel -> megacore / v7x 2-TC
            # sharding even at batch 1 (tile_h picked to keep H//tile_h even).
            dimension_semantics=("parallel", "parallel"),
            vmem_limit_bytes=vmem_limit,
        ),
    )(patches, w1s, shift, w2, b2)


# ----------------------------------------------------------------------------
# TracedModel.forward equivalent
# ----------------------------------------------------------------------------
@functools.partial(jax.jit, static_argnames=("na", "no", "tile_h", "use_bf16"))
def traced_model_forward(x_nchw, params, *, na, no, tile_h=None, use_bf16=True):
    N, _, H, W = x_nchw.shape
    # out = self.model(x); out = self.detect_layer(out)   (one fused kernel)
    det = fused_backbone_detect(x_nchw, params, tile_h=tile_h,
                                use_bf16=use_bf16)
    # Detect's view(bs, na, no, ny, nx).permute(0, 1, 3, 4, 2): same permute
    # the PyTorch reference does on its (N, na*no, H, W) conv output; the
    # kernel output is unpadded, so only real bytes move here.
    det = det.reshape(N, na, no, H, W)
    return jnp.transpose(det, (0, 1, 3, 4, 2))


# ----------------------------------------------------------------------------
# Pure-JAX reference (f32) for correctness checking
# ----------------------------------------------------------------------------
def ref_forward(x_nchw, params, *, na, no, eps=1e-3):
    N, Cin, H, W = x_nchw.shape
    Cmid = params["conv_w"].shape[-1]
    xpad = jnp.pad(x_nchw, ((0, 0), (0, 0), (1, 1), (1, 1)))
    patches = jnp.concatenate(
        [xpad[:, :, kh:kh + H, kw:kw + W] for kh in range(3) for kw in range(3)],
        axis=1)                                                # (N, 9Cin, H, W)
    w1 = jnp.transpose(params["conv_w"], (3, 0, 1, 2)).reshape(Cmid, 9 * Cin)
    y = jnp.einsum("ok,nkhw->nohw", w1, patches)
    scale = params["bn_gamma"] * lax.rsqrt(params["bn_var"] + eps)
    shift = params["bn_beta"] - params["bn_mean"] * scale
    y = y * scale[None, :, None, None] + shift[None, :, None, None]
    y = y * jax.nn.sigmoid(y)
    det = jnp.einsum("oc,nchw->nohw", params["det_w"], y)
    det = jax.nn.sigmoid(det + params["det_b"][None, :, None, None])
    return jnp.transpose(det.reshape(N, na, no, H, W), (0, 1, 3, 4, 2))


def make_params(key, cin=3, cmid=16, na=3, nc=4):
    no = nc + 5
    cdet = na * no
    k = jax.random.split(key, 4)
    params = {
        "conv_w": 0.1 * jax.random.normal(k[0], (3, 3, cin, cmid), jnp.float32),
        "bn_gamma": jnp.ones((cmid,), jnp.float32),
        "bn_beta": jnp.zeros((cmid,), jnp.float32),
        "bn_mean": 0.01 * jnp.arange(cmid, dtype=jnp.float32),
        "bn_var": jnp.ones((cmid,), jnp.float32),
        "det_w": 0.1 * jax.random.normal(k[1], (cdet, cmid), jnp.float32),
        "det_b": 0.1 * jax.random.normal(k[2], (cdet,), jnp.float32),
    }
    return params, na, no


if __name__ == "__main__":
    key = jax.random.PRNGKey(0)
    kx, kp = jax.random.split(key)

    # small shapes consistent with the module (image input, NCHW, 3 channels)
    N, C, H, W = 2, 3, 16, 16
    x = jax.random.uniform(kx, (N, C, H, W), jnp.float32)

    params, na, no = make_params(kp, cin=C, cmid=16, na=3, nc=4)

    # tile_h=8 -> grid=(N, 2), tile_h*W=128 lane-dense: exercises the tiling path.
    out = traced_model_forward(x, params, na=na, no=no, tile_h=8, use_bf16=True)
    out = jax.block_until_ready(out)

    assert out.shape == (N, na, H, W, no), out.shape
    assert bool(jnp.all(jnp.isfinite(out)))
    ref = ref_forward(x, params, na=na, no=no)
    max_err = float(jnp.max(jnp.abs(out - ref)))
    assert max_err < 3e-2, max_err
    print("KERNEL_OK")
</pallas_src>

<mosaic_0001>
module attributes {stable_mosaic.version = 11 : i64} {
  func.func @fused_backbone_detect_kernel(%arg0: i32, %arg1: i32, %arg2: memref<1x27x128xbf16, #tpu.memory_space<vmem>>, %arg3: memref<16x27xbf16, #tpu.memory_space<vmem>>, %arg4: memref<16x1xf32, #tpu.memory_space<vmem>>, %arg5: memref<27x16xf32, #tpu.memory_space<vmem>>, %arg6: memref<27x1xf32, #tpu.memory_space<vmem>>, %arg7: memref<1x27x128xf32, #tpu.memory_space<vmem>>) attributes {dimension_semantics = [#tpu.dimension_semantics<parallel>, #tpu.dimension_semantics<parallel>], iteration_bounds = array<i64: 2, 2>, scalar_prefetch = 0 : i64, scratch_operands = 0 : i64, tpu.core_type = #tpu.core_type<tc>, window_params = [{transform_indices = @transform_0, window_bounds = array<i64: 1, 27, 128>}, {pipeline_mode = #tpu.pipeline_mode<synchronous>, transform_indices = @transform_1, window_bounds = array<i64: 16, 27>}, {pipeline_mode = #tpu.pipeline_mode<synchronous>, transform_indices = @transform_2, window_bounds = array<i64: 16, 1>}, {pipeline_mode = #tpu.pipeline_mode<synchronous>, transform_indices = @transform_3, window_bounds = array<i64: 27, 16>}, {pipeline_mode = #tpu.pipeline_mode<synchronous>, transform_indices = @transform_4, window_bounds = array<i64: 27, 1>}, {transform_indices = @transform_5, window_bounds = array<i64: 1, 27, 128>}]} {
    %c0 = arith.constant 0 : index
    %c0_0 = arith.constant 0 : index
    %0 = vector.load %arg3[%c0, %c0_0] : memref<16x27xbf16, #tpu.memory_space<vmem>>, vector<16x27xbf16>
    %c0_1 = arith.constant 0 : index
    %c0_2 = arith.constant 0 : index
    %c0_3 = arith.constant 0 : index
    %1 = vector.load %arg2[%c0_1, %c0_2, %c0_3] : memref<1x27x128xbf16, #tpu.memory_space<vmem>>, vector<1x27x128xbf16>
    %2 = vector.shape_cast %1 : vector<1x27x128xbf16> to vector<27x128xbf16>
    %cst = arith.constant dense<0.000000e+00> : vector<16x128xf32>
    %3 = tpu.matmul %0, %2, %cst {dimension_numbers = #tpu.dot_dimension_numbers<[1], [0], [0], [1], [0, 0, 1, 1], [], []>} : vector<16x27xbf16>, vector<27x128xbf16>, vector<16x128xf32> -> vector<16x128xf32>
    %c0_4 = arith.constant 0 : index
    %c0_5 = arith.constant 0 : index
    %4 = vector.load %arg4[%c0_4, %c0_5] : memref<16x1xf32, #tpu.memory_space<vmem>>, vector<16x1xf32>
    %5 = vector.broadcast %4 : vector<16x1xf32> to vector<16x128xf32>
    %6 = arith.addf %3, %5 : vector<16x128xf32>
    %7 = arith.negf %6 : vector<16x128xf32>
    %8 = math.exp %7 : vector<16x128xf32>
    %cst_6 = arith.constant 1.000000e+00 : f32
    %9 = vector.broadcast %cst_6 : f32 to vector<16x128xf32>
    %10 = arith.addf %9, %8 : vector<16x128xf32>
    %11 = arith.divf %9, %10 : vector<16x128xf32>
    %12 = arith.mulf %6, %11 : vector<16x128xf32>
    %c0_7 = arith.constant 0 : index
    %c0_8 = arith.constant 0 : index
    %13 = vector.load %arg5[%c0_7, %c0_8] : memref<27x16xf32, #tpu.memory_space<vmem>>, vector<27x16xf32>
    %cst_9 = arith.constant dense<0.000000e+00> : vector<27x128xf32>
    %14 = tpu.matmul %13, %12, %cst_9 {dimension_numbers = #tpu.dot_dimension_numbers<[1], [0], [0], [1], [0, 0, 1, 1], [], []>} : vector<27x16xf32>, vector<16x128xf32>, vector<27x128xf32> -> vector<27x128xf32>
    %c0_10 = arith.constant 0 : index
    %c0_11 = arith.constant 0 : index
    %15 = vector.load %arg6[%c0_10, %c0_11] : memref<27x1xf32, #tpu.memory_space<vmem>>, vector<27x1xf32>
    %16 = vector.broadcast %15 : vector<27x1xf32> to vector<27x128xf32>
    %17 = arith.addf %14, %16 : vector<27x128xf32>
    %18 = arith.negf %17 : vector<27x128xf32>
    %19 = math.exp %18 : vector<27x128xf32>
    %cst_12 = arith.constant 1.000000e+00 : f32
    %20 = vector.broadcast %cst_12 : f32 to vector<27x128xf32>
    %21 = arith.addf %20, %19 : vector<27x128xf32>
    %22 = arith.divf %20, %21 : vector<27x128xf32>
    %23 = vector.shape_cast %22 : vector<27x128xf32> to vector<1x27x128xf32>
    %c0_13 = arith.constant 0 : index
    %c0_14 = arith.constant 0 : index
    %c0_15 = arith.constant 0 : index
    %24 = vector.load %arg7[%c0_13, %c0_14, %c0_15] : memref<1x27x128xf32, #tpu.memory_space<vmem>>, vector<1x27x128xf32>
    tpu.vector_store %arg7[%c0_13, %c0_14, %c0_15], %23 {strides = array<i32>} : memref<1x27x128xf32, #tpu.memory_space<vmem>>, vector<1x27x128xf32>,
    return
  }
  func.func @transform_0(%arg0: i32, %arg1: i32) -> (i32, i32, i32) {
    %c0_i32 = arith.constant 0 : i32
    %c0_i32_0 = arith.constant 0 : i32
    return %arg0, %c0_i32, %arg1 : i32, i32, i32
  }
  func.func @transform_1(%arg0: i32, %arg1: i32) -> (i32, i32) {
    %c0_i32 = arith.constant 0 : i32
    %c0_i32_0 = arith.constant 0 : i32
    %c0_i32_1 = arith.constant 0 : i32
    return %c0_i32, %c0_i32_0 : i32, i32
  }
  func.func @transform_2(%arg0: i32, %arg1: i32) -> (i32, i32) {
    %c0_i32 = arith.constant 0 : i32
    %c0_i32_0 = arith.constant 0 : i32
    %c0_i32_1 = arith.constant 0 : i32
    return %c0_i32, %c0_i32_0 : i32, i32
  }
  func.func @transform_3(%arg0: i32, %arg1: i32) -> (i32, i32) {
    %c0_i32 = arith.constant 0 : i32
    %c0_i32_0 = arith.constant 0 : i32
    %c0_i32_1 = arith.constant 0 : i32
    return %c0_i32, %c0_i32_0 : i32, i32
  }
  func.func @transform_4(%arg0: i32, %arg1: i32) -> (i32, i32) {
    %c0_i32 = arith.constant 0 : i32
    %c0_i32_0 = arith.constant 0 : i32
    %c0_i32_1 = arith.constant 0 : i32
    return %c0_i32, %c0_i32_0 : i32, i32
  }
  func.func @transform_5(%arg0: i32, %arg1: i32) -> (i32, i32, i32) {
    %c0_i32 = arith.constant 0 : i32
    %c0_i32_0 = arith.constant 0 : i32
    return %arg0, %c0_i32, %arg1 : i32, i32, i32
  }
}

</mosaic_0001>

<bundles_post_ra>
// kernel: traced_model_forward.1
= control target key start
LH: loop header
LB: loop body
LE: loop exit
PB: predicated region body
PF: predicated region fallthrough
CT: control target
= control target key end

     0   :  { %s910_s18 = smov 0   ;;  %s912_s19 = smov 0   ;;  %s1047_s0 = inlined_call_operand.vmem [shape: bf16[2,27,256], index: 0, kind: input, shape index: {}]   ;;  %s1048_s1 = inlined_call_operand.vmem [shape: bf16[16,27], index: 1, kind: input, shape index: {}]   ;;  %s1049_s2 = inlined_call_operand.vmem [shape: f32[16,1], index: 2, kind: input, shape index: {}]   ;;  %s1050_s3 = inlined_call_operand.vmem [shape: f32[27,16], index: 3, kind: input, shape index: {}]   ;;  %s1051_s4 = inlined_call_operand.vmem [shape: f32[27,1], index: 4, kind: input, shape index: {}]   ;;  %s1052_s5 = inlined_call_operand.vmem [shape: f32[2,27,256], index: 5, kind: output, shape index: {}]  }
   0x1   :  { %s914_s20 = smov 0   ;;  %s916_s21 = smov 0  }
   0x2   :  { %s918_s22 = smov 0   ;;  %s920_s23 = smov 0  }
   0x3   :  { %s922_s24 = smov 0  }
   0x4 LB: > { %s24_s25 = sadd.s32 1, %s866_s22  ;;  %s27_s26 = sadd.s32 1, %s870_s23  ;;  %s874_s24 = sphi %s922_s24, %s15_s24   ;;  %s870_s23 = sphi %s920_s23, %s1059_s23   ;;  %s866_s22 = sphi %s918_s22, %s1058_s22   ;;  %s862_s21 = sphi %s916_s21, %s1057_s21   ;;  %s858_s20 = sphi %s914_s20, %s1056_s20   ;;  %s854_s19 = sphi %s912_s19, %s1055_s19   ;;  %s850_s18 = sphi %s910_s18, %s1054_s18  }
   0x5   : > { %p25_p0 = scmp.ge.s32.totalorder %s24_s25, 2  ;;  %s675_s27 = sadd.s32 4294967295, %s874_s24  }
   0x6   : > { %p43_p1 = scmp.ne.s32.totalorder %s854_s19, %s850_s18  ;;  %p44_p2 = scmp.eq.s32.totalorder %s874_s24, 0 }
   0x7   : > { %s1061_s25 = smov (%p25_p0, %s24_s25), 0  ;;  %s1063_s26 = smov (!%p25_p0, %s27_s26), %s870_s23 }
   0x8   : > { %p29_p3 = scmp.ge.s32.totalorder %s1063_s26, 2  ;;  %p159_p4 = scmp.eq.s32.totalorder %s675_s27, 3 }
   0x9   : > { %s32_s28 = ssub.s32 %s866_s22, %s1061_s25  ;;  %p45_p5 = por %p44_p2, %p43_p1 }
   0xa   : > { %s1065_s26 = smov (%p29_p3, %s1063_s26), 0  ;;  %p958_p6 = por %p159_p4, %p43_p1 }
   0xb   : > { %s31_s30 = ssub.s32 %s870_s23, %s1065_s26  ;;  %s36_s7 = sadd.s32 1, %s854_s19 }
   0xc   : > { %s33_s6 = sor.u32 %s32_s28, %s31_s30  ;;  %p678_p8 = scmp.ge.s32.totalorder %s874_s24, 4 }
   0xd   : > { %p34_p7 = scmp.eq.s32.totalorder %s33_s6, 0 }
   0xe   : > { %193 = sbr.rel (%p678_p8) target bundleno = 27 (0x1b), region = 32 }
   0xf   : > { %s966_s8 = scalar_select %p34_p7, %s854_s19, %s36_s7  }
  0x13   : > { %196 = sbr.rel (!%p45_p5) target bundleno = 27 (0x1b), region = 36  ;;  %s198_s9 = sand.u32 (%p45_p5), 1, %s854_s19  }
  0x14   : > { %s680_s10 = sshll.u32 (%p45_p5), %s870_s23, 3  ;;  %s679_s11 = sshll.u32 (%p45_p5), %s198_s9, 4 }
  0x15   : > { %s202_s12 = sadd.s32 (%p45_p5), %s866_s22, %s680_s10  ;;  %s200_s17 = scalar_lea.vmem (%p45_p5), [#allocation2], %s679_s11 }
  0x16   : > { %s681_s13 = sshll.u32 (%p45_p5), %s202_s12, 2 }
  0x17   : > { %s204_s16 = scalar_lea.vmem (%p45_p5), %s1047_s0, %s681_s13 }
  0x18   : > { %v221_v0 = vld [vmem:[%s204_s16] sm:$0xf]  ;;  %v223_v1 = vld [vmem:[%s204_s16 + $0x8] sm:$0xf]  ;;  %v225_v2 = vld [vmem:[%s204_s16 + $0x10] sm:$0xf] }
  0x19   : > { %222 = vst [vmem:[%s200_s17] sm:$0xf] %v221_v0  ;;  %224 = vst [vmem:[%s200_s17 + $0x4] sm:$0xf] %v223_v1  ;;  %v227_v3 = vld [vmem:[%s204_s16 + $0x18] sm:$0xf] }
  0x1a   : > { %226 = vst [vmem:[%s200_s17 + $0x8] sm:$0xf] %v225_v2  ;;  %228 = vst [vmem:[%s200_s17 + $0xc] sm:$0xf] %v227_v3 }
  0x1b PF: > { %p682_p9 = scmp.ge.s32.totalorder %s874_s24, 1  ;;  %p259_p10 = scmp.lt.s32.totalorder %s874_s24, 5 }
  0x1d   : > { %p260_p11 = pnand %p682_p9, %p259_p10 }
  0x1e   : > { %s266_s27 = sand.u32 (!%p260_p11), 1, %s850_s18  }
  0x1f   : > { %263 = sbr.rel (%p260_p11) target bundleno = 527 (0x20f), region = 77  ;;  %s683_s28 = sshll.u32 (!%p260_p11), %s266_s27, 4 }
  0x20   : > { %s268_s30 = scalar_lea.vmem (!%p260_p11), [#allocation2], %s683_s28  ;;  %s684_s16 = sshll.u32 (!%p260_p11), %s266_s27, 5 }
  0x21   : > { %s291_s17 = scalar_lea.vmem (!%p260_p11), [#allocation3], %s684_s16 }
  0x24   : > { %vm331_vm0 = vcmask 1044480   ;;  %vm332_vm1 = vcmask 1045504   ;;  %v876_v4 = vmov 0.0   ;;  %v877_v5 = vmov 65535   ;;  %v793_v8 = vld [vmem:[%s268_s30 + $0x8] sm:$0x3f]  }
  0x25   : > { %713 = vmatprep.subr.bf16.mxu0 %v876_v4  ;;  %v333_v6 = vsel %vm331_vm0, 4294967295, %v877_v5  ;;  %vm878_vm2 = vmmov 0   ;;  %v879_v10 = vmov 0   ;;  %v300_v11 = vld [vmem:[%s1049_s2 + $0x8] sm:$0xff]  ;;  %v794_v12 = vld [vmem:[%s268_s30] sm:$0xff]   ;;  %vm327_vm3 = vcmask 220160  }
  0x26   : > { %v334_v7 = vsel %vm332_vm1, %v333_v6, 0  ;;  %717 = vmatprep.mubr.msk.bf16.mxu0 %vm878_vm2, %v876_v4  ;;  %791 = vset.pattern.permute.xlu0 %v879_v10  ;;  %v299_v13 = vld [vmem:[%s1049_s2] sm:$0xff]  ;;  %v399_v15 = vld [vmem:[%s1051_s4 + $0x10] sm:$0xff]  ;;  %vm421_vm4 = vcmask 130048   ;;  %v398_v18 = vld [vmem:[%s1051_s4 + $0x8] sm:$0xff]  ;;  %s700_s28 = sshll.u32 (%p958_p6), %s862_s21, 3 }
  0x27   : > { %v336_v9 = vand.u32 %v793_v8, %v334_v7  ;;  %792 = vset.pattern.permute.xlu1 %v879_v10  ;;  %308 = vperm.xlu0 %791, %v300_v11   ;;  %v795_v14 = vld [vmem:[%s1048_s1] sm:$0xff]   ;;  %v400_v19 = vld [vmem:[%s1051_s4 + $0x18] sm:$0x7]  ;;  %v394_v38 = vld [vmem:[%s1050_s3 + $0x8] sm:$0xff]  ;;  %s555_s30 = sadd.s32 (%p958_p6), %s858_s20, %s700_s28 }
  0x28   : > { %v393_v16 = vld [vmem:[%s1050_s3] sm:$0xff]  ;;  %v395_v39 = vld [vmem:[%s1050_s3 + $0x10] sm:$0xff]  ;;  %v396_v40 = vld [vmem:[%s1050_s3 + $0x18] sm:$0x7]  ;;  %s701_s18 = sshll.u32 (%p958_p6), %s555_s30, 3 }
  0x29   : > { %714 = vmatpush3.bf16.msra.mxu0 %v336_v9  ;;  %725 = vmatprep.mubr.msk.f32.mxu1 %vm421_vm4, %v393_v16  ;;  %v397_v17 = vld [vmem:[%s1051_s4] sm:$0xff]  ;;  %s557_s7 = scalar_lea.vmem (%p958_p6), %s1052_s5, %s701_s18 }
  0x2a   : > { %715 = vmatprep.subr.bf16.mxu0 %v876_v4  ;;  %403 = vperm.xlu1 %792, %v397_v17  }
  0x2b   : > { %303 = vperm.xlu0 %791, %v299_v13  }
  0x2d   : > { %716 = vmatpush3.bf16.msra.mxu0 %v794_v12 }
  0x2e   : > { %408 = vperm.xlu1 %792, %v398_v18  }
  0x2f   : > { %413 = vperm.xlu0 %791, %v399_v15  }
  0x30   : > { %718 = vmatmul.mubr.msk.bf16.vlgmr.msra.gmra.mxu0 %vm327_vm3, %v795_v14 }
  0x32   : > { %418 = vperm.xlu1 %792, %v400_v19  }
  0xa2   : > { %v309_v20 = vpop.permute.xlu0 %308 }
  0xa5   : > { %v404_v41 = vpop.permute.xlu1 %403 }
  0xa6   : > { %v304_v21 = vpop.permute.xlu0 %303 }
  0xa9   : > { %v409_v42 = vpop.permute.xlu1 %408 }
  0xaa   : > { %v414_v52 = vpop.permute.xlu0 %413 }
  0xad   : > { %v419_v48 = vpop.permute.xlu1 %418 }
  0xf0   : > { %v372_v22 = vpop.f32.mrf.mxu0 }
  0xf1   : > { %v373_v23 = vadd.f32 %v372_v22, %v304_v21 }
  0xf2   : > { %v719_v24 = vpop.f32.mrf.mxu0 }
  0xf3   : > { %v689_v25 = vmul.f32 -1.442695, %v373_v23 }
  0xf4   : > { %v375_v26 = vpop.f32.mrf.mxu0 }
  0xf5   : > { %796 = vpow2.f32 %v689_v25  ;;  %v376_v27 = vadd.f32 %v375_v26, %v309_v20 }
  0xf6   : > { %v720_v28 = vpop.f32.mrf.mxu0 }
  0xf7   : > { %v690_v29 = vmul.f32 -1.442695, %v376_v27 }
  0xf9   : > { %798 = vpow2.f32 %v690_v29 }
 0x102   : > { %v797_v30 = vpop.eup %796 }
 0x103   : > { %v385_v31 = vadd.f32 1.0, %v797_v30 }
 0x105   : > { %800 = vrcp.f32 %v385_v31 }
 0x106   : > { %v799_v32 = vpop.eup %798 }
 0x107   : > { %v386_v33 = vadd.f32 1.0, %v799_v32 }
 0x109   : > { %802 = vrcp.f32 %v386_v33 }
 0x112   : > { %v801_v34 = vpop.eup %800 }
 0x113   : > { %v391_v37 = vmul.f32 %v801_v34, %v373_v23 }
 0x116   : > { %v803_v35 = vpop.eup %802 }
 0x117   : > { %v392_v36 = vmul.f32 %v803_v35, %v376_v27 }
 0x119   : > { %721 = vmatprep.subr.mxu1 %v392_v36 }
 0x11a   : > { %722 = vmatpush3.msra.mxu1 %v392_v36 }
 0x11b   : > { %723 = vmatprep.subr.mxu1 %v391_v37 }
 0x11c   : > { %724 = vmatpush3.msra.mxu1 %v391_v37 }
 0x11d   : > { %726 = vmatmul.mubr.msk.f32.vlgmr.msra.gmra.mxu1 %vm421_vm4, %v394_v38 }
 0x11e   : > { %728 = vmatprep.mubr.msk.f32.mxu1 %vm421_vm4, %v395_v39 }
 0x121   : > { %729 = vmatmul.mubr.msk.f32.gmra.mxu1 %vm421_vm4, %v396_v40 }
 0x1dd   : > { %v727_v43 = vpop.f32.mrf.mxu1 }
 0x1de   : > { %v506_v44 = vadd.f32 %v727_v43, %v409_v42 }
 0x1df   : > { %v500_v45 = vpop.f32.mrf.mxu1 }
 0x1e0   : > { %v696_v46 = vmul.f32 -1.442695, %v506_v44  ;;  %v501_v47 = vadd.f32 %v500_v45, %v404_v41 }
 0x1e1   : > { %v730_v49 = vpop.f32.mrf.mxu1 }
 0x1e2   : > { %804 = vpow2.f32 %v696_v46  ;;  %v695_v50 = vmul.f32 -1.442695, %v501_v47  ;;  %v516_v51 = vadd.f32 %v730_v49, %v419_v48 }
 0x1e3   : > { %v510_v53 = vpop.f32.mrf.mxu1 }
 0x1e4   : > { %806 = vpow2.f32 %v695_v50  ;;  %v698_v54 = vmul.f32 -1.442695, %v516_v51  ;;  %v511_v55 = vadd.f32 %v510_v53, %v414_v52 }
 0x1e6   : > { %808 = vpow2.f32 %v698_v54  ;;  %v697_v56 = vmul.f32 -1.442695, %v511_v55 }
 0x1e8   : > { %810 = vpow2.f32 %v697_v56 }
 0x1ef   : > { %v805_v57 = vpop.eup %804 }
 0x1f0   : > { %v532_v58 = vadd.f32 1.0, %v805_v57 }
 0x1f1   : > { %v807_v59 = vpop.eup %806 }
 0x1f2   : > { %812 = vrcp.f32 %v532_v58  ;;  %v531_v60 = vadd.f32 1.0, %v807_v59 }
 0x1f3   : > { %v809_v61 = vpop.eup %808 }
 0x1f4   : > { %814 = vrcp.f32 %v531_v60  ;;  %v534_v62 = vadd.f32 1.0, %v809_v61 }
 0x1f5   : > { %v811_v63 = vpop.eup %810 }
 0x1f6   : > { %816 = vrcp.f32 %v534_v62  ;;  %v533_v0 = vadd.f32 1.0, %v811_v63 }
 0x1f8   : > { %818 = vrcp.f32 %v533_v0 }
 0x1ff   : > { %v813_v1 = vpop.eup %812 }
 0x200   : > { %544 = vst [vmem:[%s291_s17 + $0x8] sm:$0xff] %v813_v1 }
 0x201   : > { %v815_v2 = vpop.eup %814 }
 0x202   : > { %543 = vst [vmem:[%s291_s17] sm:$0xff] %v815_v2  ;;  %553 = sbr.rel (!%p958_p6) target bundleno = 527 (0x20f), region = 85 }
 0x203   : > { %v817_v3 = vpop.eup %816 }
 0x204   : > { %546 = vst [vmem:[%s291_s17 + $0x18] sm:$0x7] %v817_v3 }
 0x205   : > { %v819_v4 = vpop.eup %818 }
 0x206   : > { %545 = vst [vmem:[%s291_s17 + $0x10] sm:$0xff] %v819_v4 }
 0x207   : > { %v594_v6 = vld [vmem:[%s291_s17 + $0x8] sm:$0xff] }
 0x208   : > { %595 = vst [vmem:[%s557_s7 + $0x10] sm:$0xff] %v594_v6 }
 0x209   : > { %v592_v5 = vld [vmem:[%s291_s17] sm:$0xff] }
 0x20a   : > { %593 = vst [vmem:[%s557_s7] sm:$0xff] %v592_v5 }
 0x20b   : > { %v598_v8 = vld [vmem:[%s291_s17 + $0x18] sm:$0xff] }
 0x20c   : > { %599 = vst [vmem:[%s557_s7 + $0x30] sm:$0xff] %v598_v8 }
 0x20d   : > { %v596_v7 = vld [vmem:[%s291_s17 + $0x10] sm:$0xff] }
 0x20e   : > { %597 = vst [vmem:[%s557_s7 + $0x20] sm:$0xff] %v596_v7 }
 0x20f PF: > { %s15_s24 = sadd.s32 1, %s874_s24   ;;  %s1054_s18 = smov %s854_s19 }
 0x210   : > { %p12_p12 = scmp.ge.s32.totalorder %s15_s24, 6   ;;  %s1055_s19 = smov %s966_s8 }
 0x211   : > { %s1056_s20 = smov %s866_s22  ;;  %s1057_s21 = smov %s870_s23 }
 0x212   : > { %s1058_s22 = smov %s1061_s25  ;;  %s1059_s23 = smov %s1065_s26 }
 0x213   :  { %14 = sbr.rel (!%p12_p12) target bundleno = 4 (0x4), region = 154 }

</bundles_post_ra>
